<compile_context>
chip_gen: v6e
topology: v6e:2x2x1
jax: 0.10.0
libtpu: 0.0.40
codegen_flags: <defaults>
</compile_context>

<pallas_src>
import jax
import jax.numpy as jnp
from jax.experimental import pallas as pl
from jax.experimental.pallas import tpu as pltpu


def _round_up(x: int, m: int) -> int:
    return ((x + m - 1) // m) * m


def _logits_d_relu_kernel(x_ref, w1_ref, b1_ref, w2_ref, o_ref):
    # n_class == 16 path. w1_ref already holds (W1.T / T + I): the residual
    # add is folded into the first matmul.
    h = jnp.dot(x_ref[...], w1_ref[...], preferred_element_type=jnp.float32)
    h = jnp.maximum(h + b1_ref[...], 0.0)                          # bias + ReLU
    o_ref[...] = jnp.dot(h, w2_ref[...],
                         preferred_element_type=jnp.float32).astype(o_ref.dtype)


def _logits_d_fused_kernel(x_ref, wc_ref, b2_ref, o_ref):
    # n_class != 16 path: residual, bias and both linears pre-combined into
    # Wc / b2 on the wrapper side -> single MXU pass.
    dist = jnp.dot(x_ref[...], wc_ref[...], preferred_element_type=jnp.float32)
    o_ref[...] = (dist + b2_ref[...]).astype(o_ref.dtype)


def _resident_spec(shape, mode):
    """BlockSpec for a block that is identical for every grid step."""
    ndim = len(shape)
    kwargs = {} if mode is None else {"pipeline_mode": mode}
    return pl.BlockSpec(shape, lambda i: (0,) * ndim, **kwargs)


def logits_d_forward(logits, w1, b1, w2, *, n_class, temperature=1.0,
                     tile_n=2048, return_padded=False):
    """logits: [N, H] f32; w1: [H, H] (PyTorch [out, in]); b1: [H];
    w2: [C+1, H] (PyTorch [out, in], no bias). Returns [N, C+1]
    (or [N, round_up(C+1,128)] if return_padded=True; extra columns are 0)."""
    n, h = logits.shape
    c1 = w2.shape[0]                            # n_class + 1
    c_pad = _round_up(c1, 128)                  # lane-dense output width
    inv_t = 1.0 / float(temperature)            # temperature must be a Python float
    apply_relu = (n_class == 16)

    # ---- one-time, wrapper-side weight folds (cheap XLA ops per call) -----
    w2t = jnp.pad(jnp.transpose(w2), ((0, 0), (0, c_pad - c1)))    # [H, Cpad]
    b1r = b1.reshape(1, h)                                         # [1, H]

    # ---- row tiling: no batch padding; ragged tail is masked by Pallas ----
    if n <= 8:
        tn = n                                  # single full-dim block
    else:
        # fat tiles, but keep >= 2 grid steps when possible (v7x: 2 TCs)
        tn = max(8, min(int(tile_n), _round_up(pl.cdiv(n, 2), 8)))
    grid = (pl.cdiv(n, tn),)

    # ---- single-buffer large resident weights (constant index blocks) -----
    big_weights = (h * h * 4) >= (1 << 20)      # only worth it when W1t >= 1 MiB
    w_mode = pl.Buffered(1) if big_weights else None

    # ---- explicit VMEM limit only when the default scoped limit is tight --
    # TODO(synk): add a K-tiling grid axis over H (f32 VMEM accumulator, K axis
    # last/"arbitrary") for H >= ~4096 so W1t need not be fully resident on
    # v7x's 64 MiB VMEM.
    itemsize = 4
    resident_bytes = (h * h + h * c_pad + 2 * h) * itemsize
    io_bytes = 2 * (tn * h + tn * c_pad) * itemsize                # double-buffered x/out
    need = resident_bytes * (1 if big_weights else 2) + io_bytes
    vmem_limit = int(min(need * 2, 60 << 20)) if need > (12 << 20) else None

    compiler_params = pltpu.CompilerParams(
        dimension_semantics=("parallel",),      # lets v7x split rows over 2 TCs
        vmem_limit_bytes=vmem_limit)

    x_spec = pl.BlockSpec((tn, h), lambda i: (i, 0))
    out_spec = pl.BlockSpec((tn, c_pad), lambda i: (i, 0))
    out_shape = jax.ShapeDtypeStruct((n, c_pad), logits.dtype)

    if apply_relu:
        # Fold 1/T *and* the residual identity into W1.T.
        w1t = jnp.transpose(w1) * inv_t + jnp.eye(h, dtype=w1.dtype)
        out = pl.pallas_call(
            _logits_d_relu_kernel,
            out_shape=out_shape,
            grid=grid,
            in_specs=[
                x_spec,                                   # x tile
                _resident_spec((h, h), w_mode),           # W1t (resident)
                _resident_spec((1, h), w_mode),           # b1  (resident)
                _resident_spec((h, c_pad), w_mode),       # W2t (resident)
            ],
            out_specs=out_spec,
            compiler_params=compiler_params,
        )(logits, w1t, b1r, w2t)
    else:
        # dist = (x + (x/T)@W1t + b1) @ W2t  ==  x @ Wc + b2
        w1t = jnp.transpose(w1) * inv_t
        wc = w2t + jnp.dot(w1t, w2t, preferred_element_type=jnp.float32)
        b2 = jnp.dot(b1r, w2t, preferred_element_type=jnp.float32)
        out = pl.pallas_call(
            _logits_d_fused_kernel,
            out_shape=out_shape,
            grid=grid,
            in_specs=[
                x_spec,                                   # x tile
                _resident_spec((h, c_pad), w_mode),       # Wc (resident)
                _resident_spec((1, c_pad), w_mode),       # b2 (resident)
            ],
            out_specs=out_spec,
            compiler_params=compiler_params,
        )(logits, wc, b2)

    if return_padded:
        return out               # [N, Cpad]; columns c1: are exactly zero
    return out[:, :c1]           # consumers inside the same jit fuse this slice


def _reference(logits, w1, b1, w2, *, n_class, temperature=1.0):
    out = (logits / temperature) @ w1.T + b1
    out = logits + out
    if n_class == 16:
        out = jnp.maximum(out, 0.0)
    return out @ w2.T


if __name__ == "__main__":
    key = jax.random.PRNGKey(0)
    k_x, k_w1, k_b1, k_w2, k_x2 = jax.random.split(key, 5)

    # ---- case 1: n_class == 16 (ReLU path), logits dim == n_hidden --------
    n_class, n_hidden, batch = 16, 16, 8
    bound = 1.0 / jnp.sqrt(n_hidden)
    w1 = jax.random.uniform(k_w1, (n_hidden, n_hidden), jnp.float32, -bound, bound)
    b1 = jax.random.uniform(k_b1, (n_hidden,), jnp.float32, -bound, bound)
    w2 = jax.random.uniform(k_w2, (n_class + 1, n_hidden), jnp.float32, -bound, bound)
    logits = jax.random.normal(k_x, (batch, n_hidden), jnp.float32)

    out = jax.block_until_ready(
        logits_d_forward(logits, w1, b1, w2, n_class=n_class, temperature=2.0))
    ref = _reference(logits, w1, b1, w2, n_class=n_class, temperature=2.0)
    assert out.shape == (batch, n_class + 1)
    assert jnp.allclose(out, ref, atol=1e-5, rtol=1e-5), "ReLU path mismatch"

    # ---- case 2: n_class != 16 (fused single-matmul path) -----------------
    n_class2 = 10
    w2b = jax.random.uniform(k_w2, (n_class2 + 1, n_hidden), jnp.float32, -bound, bound)
    out2 = jax.block_until_ready(
        logits_d_forward(logits, w1, b1, w2b, n_class=n_class2, temperature=2.0))
    ref2 = _reference(logits, w1, b1, w2b, n_class=n_class2, temperature=2.0)
    assert out2.shape == (batch, n_class2 + 1)
    assert jnp.allclose(out2, ref2, atol=1e-5, rtol=1e-5), "fused path mismatch"

    # ---- case 3: ragged batch (no wrapper-side padding), ReLU path --------
    batch3 = 13                                   # grid=(2,), last tile ragged
    logits3 = jax.random.normal(k_x2, (batch3, n_hidden), jnp.float32)
    out3 = jax.block_until_ready(
        logits_d_forward(logits3, w1, b1, w2, n_class=n_class, temperature=1.5))
    ref3 = _reference(logits3, w1, b1, w2, n_class=n_class, temperature=1.5)
    assert out3.shape == (batch3, n_class + 1)
    assert jnp.allclose(out3, ref3, atol=1e-5, rtol=1e-5), "ragged path mismatch"

    print("KERNEL_OK")
</pallas_src>

<mosaic_0001>
module attributes {stable_mosaic.version = 11 : i64} {
  func.func @_logits_d_relu_kernel(%arg0: i32, %arg1: memref<8x16xf32, #tpu.memory_space<vmem>>, %arg2: memref<16x16xf32, #tpu.memory_space<vmem>>, %arg3: memref<1x16xf32, #tpu.memory_space<vmem>>, %arg4: memref<16x128xf32, #tpu.memory_space<vmem>>, %arg5: memref<8x128xf32, #tpu.memory_space<vmem>>) attributes {dimension_semantics = [#tpu.dimension_semantics<parallel>], iteration_bounds = array<i64: 1>, scalar_prefetch = 0 : i64, scratch_operands = 0 : i64, tpu.core_type = #tpu.core_type<tc>, window_params = [{transform_indices = @transform_0, window_bounds = array<i64: 8, 16>}, {pipeline_mode = #tpu.pipeline_mode<synchronous>, transform_indices = @transform_1, window_bounds = array<i64: 16, 16>}, {pipeline_mode = #tpu.pipeline_mode<synchronous>, transform_indices = @transform_2, window_bounds = array<i64: 1, 16>}, {pipeline_mode = #tpu.pipeline_mode<synchronous>, transform_indices = @transform_3, window_bounds = array<i64: 16, 128>}, {transform_indices = @transform_4, window_bounds = array<i64: 8, 128>}]} {
    %c0 = arith.constant 0 : index
    %c0_0 = arith.constant 0 : index
    %0 = vector.load %arg1[%c0, %c0_0] : memref<8x16xf32, #tpu.memory_space<vmem>>, vector<8x16xf32>
    %c0_1 = arith.constant 0 : index
    %c0_2 = arith.constant 0 : index
    %1 = vector.load %arg2[%c0_1, %c0_2] : memref<16x16xf32, #tpu.memory_space<vmem>>, vector<16x16xf32>
    %cst = arith.constant dense<0.000000e+00> : vector<8x16xf32>
    %2 = tpu.matmul %0, %1, %cst {dimension_numbers = #tpu.dot_dimension_numbers<[1], [0], [0], [1], [0, 0, 1, 1], [], []>} : vector<8x16xf32>, vector<16x16xf32>, vector<8x16xf32> -> vector<8x16xf32>
    %c0_3 = arith.constant 0 : index
    %c0_4 = arith.constant 0 : index
    %3 = vector.load %arg3[%c0_3, %c0_4] : memref<1x16xf32, #tpu.memory_space<vmem>>, vector<1x16xf32>
    %4 = vector.broadcast %3 : vector<1x16xf32> to vector<8x16xf32>
    %5 = arith.addf %2, %4 : vector<8x16xf32>
    %cst_5 = arith.constant 0.000000e+00 : f32
    %6 = vector.broadcast %cst_5 : f32 to vector<8x16xf32>
    %7 = arith.maximumf %5, %6 : vector<8x16xf32>
    %c0_6 = arith.constant 0 : index
    %c0_7 = arith.constant 0 : index
    %8 = vector.load %arg4[%c0_6, %c0_7] : memref<16x128xf32, #tpu.memory_space<vmem>>, vector<16x128xf32>
    %cst_8 = arith.constant dense<0.000000e+00> : vector<8x128xf32>
    %9 = tpu.matmul %7, %8, %cst_8 {dimension_numbers = #tpu.dot_dimension_numbers<[1], [0], [0], [1], [0, 0, 1, 1], [], []>} : vector<8x16xf32>, vector<16x128xf32>, vector<8x128xf32> -> vector<8x128xf32>
    %c0_9 = arith.constant 0 : index
    %c0_10 = arith.constant 0 : index
    %10 = vector.load %arg5[%c0_9, %c0_10] : memref<8x128xf32, #tpu.memory_space<vmem>>, vector<8x128xf32>
    tpu.vector_store %arg5[%c0_9, %c0_10], %9 {strides = array<i32>} : memref<8x128xf32, #tpu.memory_space<vmem>>, vector<8x128xf32>,
    return
  }
  func.func @transform_0(%arg0: i32) -> (i32, i32) {
    %c0_i32 = arith.constant 0 : i32
    %c0_i32_0 = arith.constant 0 : i32
    return %arg0, %c0_i32 : i32, i32
  }
  func.func @transform_1(%arg0: i32) -> (i32, i32) {
    %c0_i32 = arith.constant 0 : i32
    %c0_i32_0 = arith.constant 0 : i32
    %c0_i32_1 = arith.constant 0 : i32
    return %c0_i32, %c0_i32_0 : i32, i32
  }
  func.func @transform_2(%arg0: i32) -> (i32, i32) {
    %c0_i32 = arith.constant 0 : i32
    %c0_i32_0 = arith.constant 0 : i32
    %c0_i32_1 = arith.constant 0 : i32
    return %c0_i32, %c0_i32_0 : i32, i32
  }
  func.func @transform_3(%arg0: i32) -> (i32, i32) {
    %c0_i32 = arith.constant 0 : i32
    %c0_i32_0 = arith.constant 0 : i32
    %c0_i32_1 = arith.constant 0 : i32
    return %c0_i32, %c0_i32_0 : i32, i32
  }
  func.func @transform_4(%arg0: i32) -> (i32, i32) {
    %c0_i32 = arith.constant 0 : i32
    %c0_i32_0 = arith.constant 0 : i32
    return %arg0, %c0_i32 : i32, i32
  }
}

</mosaic_0001>

<bundles_post_ra>
// kernel: tpu_custom_call.1
= control target key start
LH: loop header
LB: loop body
LE: loop exit
PB: predicated region body
PF: predicated region fallthrough
CT: control target
= control target key end

     0   :  { %9 = vsyncpa [#allocation3], 0  ;;  %s399_s0 = inlined_call_operand.hbm [shape: f32[8,16], index: 0, kind: input, shape index: {}]   ;;  %s400_s1 = inlined_call_operand.hbm [shape: f32[16,16], index: 1, kind: input, shape index: {}]   ;;  %s401_s2 = inlined_call_operand.vmem [shape: f32[1,16], index: 2, kind: input, shape index: {}]   ;;  %s402_s3 = inlined_call_operand.hbm [shape: f32[16,128], index: 3, kind: input, shape index: {}]   ;;  %s403_s4 = inlined_call_operand.hbm [shape: f32[8,128], index: 4, kind: output, shape index: {}]  }
   0x1   :  { %10 = vsyncpa [#allocation6], 0 }
   0x2   :  { %11 = vsyncpa [#allocation4], 0  ;;  %s351_s15 = smov [#allocation5]  }
   0x3   :  { %s27_s16 = sshll.u32 %s351_s15, 4  ;;  %s28_s16 = int_to_ptr.vmem [resolvable:$true] %s27_s16 }
   0x4   :  { %s273_s17 = scalar_lea.vmem %s28_s16, 256  ;;  %p278_p1 = scmp.lt.s32.totalorder %s28_s16, %s28_s16 }
   0x5   :  { %p274_p0 = scmp.ne.s32.totalorder %s28_s16, %s273_s17  ;;  %p279_p2 = scmp.lt.s32.totalorder %s273_s17, %s273_s17 }
   0x7   :  { %p280_p3 = por %p279_p2, %p278_p1 }
   0x9   :  { %p281_p4 = pnand %p280_p3, %p274_p0 }
   0xb   :  { %284 = shalt.err (!%p281_p4)
}
   0xc   :  { %s352_s18 = smov 128   ;;  %s353_s19 = smov 8  }
   0xd   :  { %33 = dma.hbm_to_vmem [thread:$0]  %s400_s1, 256, %s28_s16, [#allocation6], %s352_s18, %s352_s18, %s353_s19  }
   0xe   :  { %s354_s22 = smov [#allocation2]   ;;  %s355_s24 = smov [#allocation7]  }
   0xf   :  { %s18_s23 = sshll.u32 %s354_s22, 4  ;;  %s41_s25 = sshll.u32 %s355_s24, 4  ;;  %s19_s23 = int_to_ptr.vmem [resolvable:$true] %s18_s23  ;;  %s42_s25 = int_to_ptr.vmem [resolvable:$true] %s41_s25 }
  0x10   :  { %s293_s26 = scalar_lea.vmem %s19_s23, 128  ;;  %p298_p6 = scmp.lt.s32.totalorder %s19_s23, %s19_s23 }
  0x11   :  { %p294_p5 = scmp.ne.s32.totalorder %s19_s23, %s293_s26  ;;  %p299_p7 = scmp.lt.s32.totalorder %s293_s26, %s293_s26 }
  0x13   :  { %p300_p8 = por %p299_p7, %p298_p6 }
  0x15   :  { %p301_p9 = pnand %p300_p8, %p294_p5 }
  0x17   :  { %304 = shalt.err (!%p301_p9)
}
  0x18   :  { %21 = dma.hbm_to_vmem [thread:$0]  %s399_s0, 128, %s19_s23, [#allocation3]  }
  0x19   :  { %s313_s29 = scalar_lea.vmem %s42_s25, 256  ;;  %p318_p11 = scmp.lt.s32.totalorder %s42_s25, %s42_s25 }
  0x1a   :  { %p314_p10 = scmp.ne.s32.totalorder %s42_s25, %s313_s29  ;;  %p319_p12 = scmp.lt.s32.totalorder %s313_s29, %s313_s29 }
  0x1c   :  { %p320_p13 = por %p319_p12, %p318_p11 }
  0x1e   :  { %p321_p0 = pnand %p320_p13, %p314_p10 }
  0x20   :  { %324 = shalt.err (!%p321_p0)
}
  0x21   :  { %47 = dma.hbm_to_vmem [thread:$0]  %s402_s3, 256, %s42_s25, [#allocation6], %s352_s18, %s352_s18, %s353_s19  }
  0x22   :  { %345 = dma.done.wait [#allocation3], 128  }
  0x23   :  { %346 = vsyncadd [#allocation3], 4294967168 }
  0x24   :  { %347 = dma.done.wait [#allocation6], 512  }
  0x25   :  { %348 = vsyncadd [#allocation6], 4294966784  ;;  %v356_v0 = vmov 0.0   ;;  %vm357_vm0 = vmmov 0   ;;  %v59_v1 = vld [vmem:[#allocation5 + $0x8] sm:$0xff]  ;;  %v58_v2 = vld [vmem:[#allocation5] sm:$0xff] }
  0x26   :  { %243 = vmatprep.subr.mxu0 %v356_v0  ;;  %247 = vmatprep.mubr.msk.f32.mxu0 %vm357_vm0, %v356_v0  ;;  %v57_v3 = vld [vmem:[#allocation2] sm:$0xff]  ;;  %vm67_vm1 = vcmask 130048   ;;  %v142_v5 = vld [vmem:[#allocation7] sm:$0xff]  ;;  %s358_s5 = smov [#allocation8]  }
  0x27   :  { %250 = vmatprep.subr.mxu1 %v356_v0  ;;  %254 = vmatprep.mubr.msk.f32.mxu1 %vm357_vm0, %v356_v0  ;;  %v143_v4 = vld [vmem:[#allocation7 + $0x8] sm:$0xff]  ;;  %s224_s6 = sshll.u32 %s358_s5, 4  ;;  %s225_s6 = int_to_ptr.vmem [resolvable:$true] %s224_s6 }
  0x28   :  { %244 = vmatpush3.msra.mxu0 %v59_v1  ;;  %251 = vmatpush3.msra.mxu1 %v143_v4  ;;  %v234_v6 = vld [vmem:[%s401_s2] ss:$0 sm:$0xff]  ;;  %s325_s7 = scalar_lea.vmem %s225_s6, 128  ;;  %p330_p2 = scmp.lt.s32.totalorder %s225_s6, %s225_s6 }
  0x29   :  { %245 = vmatprep.subr.mxu0 %v356_v0  ;;  %252 = vmatprep.subr.mxu1 %v356_v0  ;;  %p326_p1 = scmp.ne.s32.totalorder %s225_s6, %s325_s7  ;;  %p331_p3 = scmp.lt.s32.totalorder %s325_s7, %s325_s7 }
  0x2a   :  { %246 = vmatpush3.msra.mxu0 %v58_v2  ;;  %253 = vmatpush3.msra.mxu1 %v142_v5 }
  0x2b   :  { %248 = vmatmul.mubr.msk.f32.vlgmr.msra.gmra.mxu0 %vm67_vm1, %v57_v3  ;;  %p332_p4 = por %p331_p3, %p330_p2 }
  0x2d   :  { %p333_p5 = pnand %p332_p4, %p326_p1 }
  0xeb   :  { %v137_v7 = vpop.f32.mrf.mxu0 }
  0xec   :  { %v138_v8 = vadd.f32 %v234_v6, %v137_v7 }
  0xed   :  { %v249_v9 = vpop.f32.mrf.mxu0 }
  0xee   :  { %v141_v10 = vmax.f32 %v138_v8, 0.0 }
  0xf0   :  { %255 = vmatmul.mubr.msk.f32.vlgmr.msra.gmra.mxu1 %vm67_vm1, %v141_v10 }
 0x1b0   :  { %v213_v11 = vpop.f32.mrf.mxu1 }
 0x1b1   :  { %217 = vst [vmem:[#allocation8] sm:$0xff] %v213_v11 }
 0x1b2   :  { %v256_v12 = vpop.f32.mrf.mxu1 }
 0x1b3   :  { %336 = shalt.err (!%p333_p5)
}
 0x1b4   :  { %227 = dma.vmem_to_hbm [thread:$0]  %s225_s6, 128, %s403_s4, [#allocation4]  }
 0x1b5   :  { %349 = dma.done.wait [#allocation4], 128  }
 0x1b6   :  { %350 = vsyncadd [#allocation4], 4294967168 }
 0x1b7   :  { %231 = vsyncpa [#allocation3], 1 }
 0x1b8   :  { %232 = vsyncpa [#allocation6], 1 }
 0x1b9   :  { %233 = vsyncpa [#allocation4], 1 }

</bundles_post_ra>
